<compile_context>
chip_gen: v6e
topology: v6e:2x2x1
jax: 0.10.0
libtpu: 0.0.40
codegen_flags: <defaults>
</compile_context>

<pallas_src>
import functools

import jax
import jax.numpy as jnp
from jax.experimental import pallas as pl
from jax.experimental.pallas import tpu as pltpu


# --------------------------------------------------------------------------
# Kernel
# --------------------------------------------------------------------------
def attention_block_kernel(
    g_ref, x_ref,          # (Bb, F_g, TILE_N), (Bb, F_l, TILE_N)
    wgT_ref, wxT_ref,      # (F_int, F_g), (F_int, F_l)   BN scale folded in
    t_ref,                 # (F_int, 1)   combined bias + BN shift (both branches)
    wpsiT_ref,             # (1, F_int)   BN scale folded in
    tpsi_ref,              # (1,) SMEM scalar: psi bias + BN shift
    out_ref,               # (Bb, F_l, TILE_N)
    *, bb,
):
    wg = wgT_ref[...]
    wx = wxT_ref[...]
    wpsi = wpsiT_ref[...]
    t = t_ref[...]
    tpsi = tpsi_ref[0]

    # Small static unroll over the images packed into this grid step.  Each
    # image is a pure 2-D lane-dense problem (no in-kernel transposes).
    for b in range(bb):
        g = g_ref[b]                                   # (F_g, T)
        x = x_ref[b]                                   # (F_l, T)

        # W_g / W_x branches: two small-K MXU matmuls accumulated in f32.
        h = jnp.dot(wg, g, preferred_element_type=jnp.float32)
        h = h + jnp.dot(wx, x, preferred_element_type=jnp.float32)
        h = jnp.maximum(h + t, 0.0)                    # (F_int, T)

        # psi branch: 1x1 conv to one channel + folded BN + sigmoid.
        psi = jnp.dot(wpsi, h, preferred_element_type=jnp.float32)
        psi = jax.nn.sigmoid(psi + tpsi)               # (1, T)

        # Gate x by psi (f32 gate even when streaming bf16; v5e VPU lacks bf16).
        out_ref[b] = (x.astype(jnp.float32) * psi).astype(out_ref.dtype)


# --------------------------------------------------------------------------
# Tiling heuristics
# --------------------------------------------------------------------------
def _vmem_budget():
    """Generation-aware (budget_for_tiles, vmem_limit_bytes)."""
    try:
        cap = int(pltpu.get_tpu_info().vmem_capacity_bytes)
    except Exception:  # pragma: no cover - conservative fallback
        cap = 64 * 1024 * 1024
    vmem_limit = min(cap // 2, 64 * 1024 * 1024)          # 32 MiB v7x, 64 MiB v5e/v6e
    budget = min(vmem_limit - 8 * 1024 * 1024, 40 * 1024 * 1024)
    return max(budget, 4 * 1024 * 1024), vmem_limit


def _choose_tiling(B, N, F_g, F_l, F_int, in_bytes, out_bytes, target_cols, budget):
    """Pick (Bb images per step, lane tile) under the VMEM budget."""
    # Double-buffered streams (g, x, out) + single-buffered f32 intermediates
    # (h, psi and a little slack for temporaries), per column per image.
    stream_bpc = in_bytes * (F_g + F_l) + out_bytes * F_l
    scratch_bpc = 4 * (F_int + 4)
    max_cols = max(128, budget // (2 * stream_bpc + scratch_bpc))
    cols = max(128, min(target_cols, max_cols))

    if N >= cols or B == 1:
        bb = 1
        tile = N if cols >= N else (cols // 128) * 128     # full extent or 128-aligned
        # Keep >=2 grid steps for a single image (v7x has 2 TensorCores).
        if B == 1 and tile == N and N > 128:
            split = max(128, (pl.cdiv(N, 2) // 128) * 128)
            if split < N:
                tile = split
    else:
        # Small spatial extent: pack several images per step (weights shared).
        bb = min(B, max(1, cols // max(N, 128)), 16)
        bb = min(bb, max(1, B // 2))                        # >=2 batch steps if possible
        while B % bb:
            bb -= 1
        tile = N                                            # full extent -> no padding
    return bb, tile


# --------------------------------------------------------------------------
# Wrapper
# --------------------------------------------------------------------------
def attention_block(g, x, params, *, target_cols=32768, out_dtype=None, eps=1e-5):
    """g: (B, F_g, H, W), x: (B, F_l, H, W)  ->  (B, F_l, H, W)."""
    B, F_g, H, W = g.shape
    Bx, F_l, Hx, Wx = x.shape
    assert (B, H, W) == (Bx, Hx, Wx)
    F_int = params["wg"].shape[1]
    out_dtype = x.dtype if out_dtype is None else out_dtype

    # ---- glue: fold conv bias + eval-mode BatchNorm into weights / shifts ----
    sg = params["g_gamma"] / jnp.sqrt(params["g_var"] + eps)
    sx = params["x_gamma"] / jnp.sqrt(params["x_var"] + eps)
    spsi = params["psi_gamma"] / jnp.sqrt(params["psi_var"] + eps)

    wgT = (params["wg"] * sg[None, :]).T.astype(jnp.float32)        # (F_int, F_g)
    wxT = (params["wx"] * sx[None, :]).T.astype(jnp.float32)        # (F_int, F_l)
    tg = (params["bg"] - params["g_mean"]) * sg + params["g_beta"]
    tx = (params["bx"] - params["x_mean"]) * sx + params["x_beta"]
    t_gx = (tg + tx)[:, None].astype(jnp.float32)                   # (F_int, 1)
    wpsiT = (params["wpsi"] * spsi[None, :]).T.astype(jnp.float32)  # (1, F_int)
    tpsi = ((params["bpsi"] - params["psi_mean"]) * spsi
            + params["psi_beta"]).reshape(1).astype(jnp.float32)    # (1,) SMEM

    # ---- lane-dense layout: NCHW -> (B, C, H*W) is a free reshape -----------
    N = H * W
    g3 = g.reshape(B, F_g, N)
    x3 = x.reshape(B, F_l, N)

    budget, vmem_limit = _vmem_budget()
    bb, tile = _choose_tiling(
        B, N, F_g, F_l, F_int,
        in_bytes=max(g3.dtype.itemsize, x3.dtype.itemsize),
        out_bytes=jnp.dtype(out_dtype).itemsize,
        target_cols=target_cols, budget=budget)

    grid = (B // bb, pl.cdiv(N, tile))

    def stream_spec(c):
        return pl.BlockSpec((bb, c, tile), lambda b, i: (b, 0, i))

    def full_spec(shape):
        return pl.BlockSpec(shape, lambda b, i: (0,) * len(shape))

    out3 = pl.pallas_call(
        functools.partial(attention_block_kernel, bb=bb),
        out_shape=jax.ShapeDtypeStruct((B, F_l, N), out_dtype),
        grid=grid,
        in_specs=[
            stream_spec(F_g),                                   # g
            stream_spec(F_l),                                   # x
            full_spec((F_int, F_g)),                            # wgT
            full_spec((F_int, F_l)),                            # wxT
            full_spec((F_int, 1)),                              # t
            full_spec((1, F_int)),                              # wpsiT
            pl.BlockSpec(memory_space=pltpu.MemorySpace.SMEM),  # tpsi scalar
        ],
        out_specs=stream_spec(F_l),
        compiler_params=pltpu.CompilerParams(
            dimension_semantics=("parallel", "parallel"),
            vmem_limit_bytes=int(vmem_limit)),
    )(g3, x3, wgT, wxT, t_gx, wpsiT, tpsi)

    return out3.reshape(B, F_l, H, W)


# --------------------------------------------------------------------------
# Reference + test
# --------------------------------------------------------------------------
def init_params(key, F_g, F_l, F_int):
    ks = jax.random.split(key, 12)
    return {
        "wg": jax.random.normal(ks[0], (F_g, F_int), jnp.float32) * 0.1,
        "bg": jax.random.normal(ks[1], (F_int,), jnp.float32) * 0.1,
        "wx": jax.random.normal(ks[2], (F_l, F_int), jnp.float32) * 0.1,
        "bx": jax.random.normal(ks[3], (F_int,), jnp.float32) * 0.1,
        "wpsi": jax.random.normal(ks[4], (F_int, 1), jnp.float32) * 0.1,
        "bpsi": jax.random.normal(ks[5], (1,), jnp.float32) * 0.1,
        "g_gamma": 1.0 + 0.1 * jax.random.normal(ks[6], (F_int,), jnp.float32),
        "g_beta": 0.1 * jax.random.normal(ks[7], (F_int,), jnp.float32),
        "g_mean": 0.1 * jax.random.normal(ks[8], (F_int,), jnp.float32),
        "g_var": jnp.abs(1.0 + 0.1 * jax.random.normal(ks[9], (F_int,), jnp.float32)),
        "x_gamma": 1.0 + 0.1 * jax.random.normal(ks[10], (F_int,), jnp.float32),
        "x_beta": 0.1 * jax.random.normal(ks[11], (F_int,), jnp.float32),
        "x_mean": jnp.zeros((F_int,), jnp.float32),
        "x_var": jnp.ones((F_int,), jnp.float32),
        "psi_gamma": jnp.ones((1,), jnp.float32),
        "psi_beta": jnp.zeros((1,), jnp.float32),
        "psi_mean": jnp.zeros((1,), jnp.float32),
        "psi_var": jnp.ones((1,), jnp.float32),
    }


def reference(g, x, params, eps=1e-5):
    def branch(inp, w, b, gamma, beta, mean, var):
        y = jnp.einsum("bchw,cf->bfhw", inp, w) + b[None, :, None, None]
        scale = gamma / jnp.sqrt(var + eps)
        return (y - mean[None, :, None, None]) * scale[None, :, None, None] \
            + beta[None, :, None, None]

    g1 = branch(g, params["wg"], params["bg"], params["g_gamma"],
                params["g_beta"], params["g_mean"], params["g_var"])
    x1 = branch(x, params["wx"], params["bx"], params["x_gamma"],
                params["x_beta"], params["x_mean"], params["x_var"])
    h = jnp.maximum(g1 + x1, 0.0)
    psi = branch(h, params["wpsi"], params["bpsi"], params["psi_gamma"],
                 params["psi_beta"], params["psi_mean"], params["psi_var"])
    psi = jax.nn.sigmoid(psi)
    return x * psi


if __name__ == "__main__":
    # TODO(synk): train-mode BatchNorm (batch-stat computation/update) is not
    # implemented; eval-mode running stats are folded into the kernel weights.
    key = jax.random.PRNGKey(0)
    kg, kx, kp, kg2, kx2 = jax.random.split(key, 5)

    # Case 1: B=2, 16x16 maps, f32 streaming (Bb=1 path), tight tolerance.
    B, F_g, F_l, F_int, H, W = 2, 8, 8, 16, 16, 16
    params = init_params(kp, F_g, F_l, F_int)
    g = jax.random.normal(kg, (B, F_g, H, W), jnp.float32)
    x = jax.random.normal(kx, (B, F_l, H, W), jnp.float32)

    out = jax.block_until_ready(attention_block(g, x, params))
    ref = reference(g, x, params)
    assert out.shape == (B, F_l, H, W)
    assert jnp.allclose(out, ref, atol=1e-4, rtol=1e-4), "f32 mismatch vs reference"

    # Case 2: B=4, 8x8 maps -> multi-image-per-step path (Bb>1), f32.
    B2, H2, W2 = 4, 8, 8
    g2 = jax.random.normal(kg2, (B2, F_g, H2, W2), jnp.float32)
    x2 = jax.random.normal(kx2, (B2, F_l, H2, W2), jnp.float32)
    out2 = jax.block_until_ready(attention_block(g2, x2, params))
    ref2 = reference(g2, x2, params)
    assert jnp.allclose(out2, ref2, atol=1e-4, rtol=1e-4), "batched-step mismatch"

    # Case 3: bf16 streaming of g/x (halves HBM bytes); f32 accumulate inside.
    out_bf16 = jax.block_until_ready(
        attention_block(g.astype(jnp.bfloat16), x.astype(jnp.bfloat16), params,
                        out_dtype=jnp.float32))
    assert jnp.allclose(out_bf16, ref, atol=1e-1, rtol=1e-1), "bf16 mismatch"

    print("KERNEL_OK")
</pallas_src>

<mosaic_0001>
module attributes {stable_mosaic.version = 11 : i64} {
  func.func @attention_block_kernel(%arg0: i32, %arg1: i32, %arg2: memref<1x8x256xf32, #tpu.memory_space<vmem>>, %arg3: memref<1x8x256xf32, #tpu.memory_space<vmem>>, %arg4: memref<16x8xf32, #tpu.memory_space<vmem>>, %arg5: memref<16x8xf32, #tpu.memory_space<vmem>>, %arg6: memref<16x1xf32, #tpu.memory_space<vmem>>, %arg7: memref<1x16xf32, #tpu.memory_space<vmem>>, %arg8: memref<1xf32, #tpu.memory_space<smem>>, %arg9: memref<1x8x256xf32, #tpu.memory_space<vmem>>) attributes {dimension_semantics = [#tpu.dimension_semantics<parallel>, #tpu.dimension_semantics<parallel>], iteration_bounds = array<i64: 2, 1>, scalar_prefetch = 0 : i64, scratch_operands = 0 : i64, tpu.core_type = #tpu.core_type<tc>, window_params = [{transform_indices = @transform_0, window_bounds = array<i64: 1, 8, 256>}, {transform_indices = @transform_1, window_bounds = array<i64: 1, 8, 256>}, {pipeline_mode = #tpu.pipeline_mode<synchronous>, transform_indices = @transform_2, window_bounds = array<i64: 16, 8>}, {pipeline_mode = #tpu.pipeline_mode<synchronous>, transform_indices = @transform_3, window_bounds = array<i64: 16, 8>}, {pipeline_mode = #tpu.pipeline_mode<synchronous>, transform_indices = @transform_4, window_bounds = array<i64: 16, 1>}, {pipeline_mode = #tpu.pipeline_mode<synchronous>, transform_indices = @transform_5, window_bounds = array<i64: 1, 16>}, {transform_indices = @transform_6, window_bounds = array<i64: 1>}, {transform_indices = @transform_7, window_bounds = array<i64: 1, 8, 256>}]} {
    %c0 = arith.constant 0 : index
    %c0_0 = arith.constant 0 : index
    %0 = vector.load %arg4[%c0, %c0_0] : memref<16x8xf32, #tpu.memory_space<vmem>>, vector<16x8xf32>
    %c0_1 = arith.constant 0 : index
    %c0_2 = arith.constant 0 : index
    %1 = vector.load %arg5[%c0_1, %c0_2] : memref<16x8xf32, #tpu.memory_space<vmem>>, vector<16x8xf32>
    %c0_3 = arith.constant 0 : index
    %c0_4 = arith.constant 0 : index
    %2 = vector.load %arg7[%c0_3, %c0_4] : memref<1x16xf32, #tpu.memory_space<vmem>>, vector<1x16xf32>
    %c0_5 = arith.constant 0 : index
    %c0_6 = arith.constant 0 : index
    %3 = vector.load %arg6[%c0_5, %c0_6] : memref<16x1xf32, #tpu.memory_space<vmem>>, vector<16x1xf32>
    %c0_7 = arith.constant 0 : index
    %4 = memref.load %arg8[%c0_7] : memref<1xf32, #tpu.memory_space<smem>>
    %c0_8 = arith.constant 0 : index
    %c0_9 = arith.constant 0 : index
    %c0_10 = arith.constant 0 : index
    %5 = vector.load %arg2[%c0_8, %c0_9, %c0_10] : memref<1x8x256xf32, #tpu.memory_space<vmem>>, vector<1x8x256xf32>
    %6 = vector.shape_cast %5 : vector<1x8x256xf32> to vector<8x256xf32>
    %c0_11 = arith.constant 0 : index
    %c0_12 = arith.constant 0 : index
    %c0_13 = arith.constant 0 : index
    %7 = vector.load %arg3[%c0_11, %c0_12, %c0_13] : memref<1x8x256xf32, #tpu.memory_space<vmem>>, vector<1x8x256xf32>
    %8 = vector.shape_cast %7 : vector<1x8x256xf32> to vector<8x256xf32>
    %cst = arith.constant dense<0.000000e+00> : vector<16x256xf32>
    %9 = tpu.matmul %0, %6, %cst {dimension_numbers = #tpu.dot_dimension_numbers<[1], [0], [0], [1], [0, 0, 1, 1], [], []>} : vector<16x8xf32>, vector<8x256xf32>, vector<16x256xf32> -> vector<16x256xf32>
    %cst_14 = arith.constant dense<0.000000e+00> : vector<16x256xf32>
    %10 = tpu.matmul %1, %8, %cst_14 {dimension_numbers = #tpu.dot_dimension_numbers<[1], [0], [0], [1], [0, 0, 1, 1], [], []>} : vector<16x8xf32>, vector<8x256xf32>, vector<16x256xf32> -> vector<16x256xf32>
    %11 = arith.addf %9, %10 : vector<16x256xf32>
    %12 = vector.broadcast %3 : vector<16x1xf32> to vector<16x256xf32>
    %13 = arith.addf %11, %12 : vector<16x256xf32>
    %cst_15 = arith.constant 0.000000e+00 : f32
    %14 = vector.broadcast %cst_15 : f32 to vector<16x256xf32>
    %15 = arith.maximumf %13, %14 : vector<16x256xf32>
    %cst_16 = arith.constant dense<0.000000e+00> : vector<1x256xf32>
    %16 = tpu.matmul %2, %15, %cst_16 {dimension_numbers = #tpu.dot_dimension_numbers<[1], [0], [0], [1], [0, 0, 1, 1], [], []>} : vector<1x16xf32>, vector<16x256xf32>, vector<1x256xf32> -> vector<1x256xf32>
    %17 = vector.broadcast %4 : f32 to vector<1x256xf32>
    %18 = arith.addf %16, %17 : vector<1x256xf32>
    %19 = arith.negf %18 : vector<1x256xf32>
    %20 = math.exp %19 : vector<1x256xf32>
    %cst_17 = arith.constant 1.000000e+00 : f32
    %21 = vector.broadcast %cst_17 : f32 to vector<1x256xf32>
    %22 = arith.addf %21, %20 : vector<1x256xf32>
    %23 = arith.divf %21, %22 : vector<1x256xf32>
    %24 = vector.broadcast %23 : vector<1x256xf32> to vector<8x256xf32>
    %25 = arith.mulf %8, %24 : vector<8x256xf32>
    %c0_18 = arith.constant 0 : index
    %c0_19 = arith.constant 0 : index
    %c0_20 = arith.constant 0 : index
    %26 = vector.load %arg9[%c0_18, %c0_19, %c0_20] : memref<1x8x256xf32, #tpu.memory_space<vmem>>, vector<1x8x256xf32>
    %27 = vector.shape_cast %26 : vector<1x8x256xf32> to vector<8x256xf32>
    %28 = vector.shape_cast %25 : vector<8x256xf32> to vector<1x8x256xf32>
    tpu.vector_store %arg9[%c0_18, %c0_19, %c0_20], %28 {strides = array<i32>} : memref<1x8x256xf32, #tpu.memory_space<vmem>>, vector<1x8x256xf32>,
    return
  }
  func.func @transform_0(%arg0: i32, %arg1: i32) -> (i32, i32, i32) {
    %c0_i32 = arith.constant 0 : i32
    %c0_i32_0 = arith.constant 0 : i32
    return %arg0, %c0_i32, %arg1 : i32, i32, i32
  }
  func.func @transform_1(%arg0: i32, %arg1: i32) -> (i32, i32, i32) {
    %c0_i32 = arith.constant 0 : i32
    %c0_i32_0 = arith.constant 0 : i32
    return %arg0, %c0_i32, %arg1 : i32, i32, i32
  }
  func.func @transform_2(%arg0: i32, %arg1: i32) -> (i32, i32) {
    %c0_i32 = arith.constant 0 : i32
    %c0_i32_0 = arith.constant 0 : i32
    %c0_i32_1 = arith.constant 0 : i32
    return %c0_i32, %c0_i32_0 : i32, i32
  }
  func.func @transform_3(%arg0: i32, %arg1: i32) -> (i32, i32) {
    %c0_i32 = arith.constant 0 : i32
    %c0_i32_0 = arith.constant 0 : i32
    %c0_i32_1 = arith.constant 0 : i32
    return %c0_i32, %c0_i32_0 : i32, i32
  }
  func.func @transform_4(%arg0: i32, %arg1: i32) -> (i32, i32) {
    %c0_i32 = arith.constant 0 : i32
    %c0_i32_0 = arith.constant 0 : i32
    %c0_i32_1 = arith.constant 0 : i32
    return %c0_i32, %c0_i32_0 : i32, i32
  }
  func.func @transform_5(%arg0: i32, %arg1: i32) -> (i32, i32) {
    %c0_i32 = arith.constant 0 : i32
    %c0_i32_0 = arith.constant 0 : i32
    %c0_i32_1 = arith.constant 0 : i32
    return %c0_i32, %c0_i32_0 : i32, i32
  }
  func.func @transform_6(%arg0: i32, %arg1: i32) -> i32 {
    %c0_i32 = arith.constant 0 : i32
    %c0_i32_0 = arith.constant 0 : i32
    return %c0_i32 : i32
  }
  func.func @transform_7(%arg0: i32, %arg1: i32) -> (i32, i32, i32) {
    %c0_i32 = arith.constant 0 : i32
    %c0_i32_0 = arith.constant 0 : i32
    return %arg0, %c0_i32, %arg1 : i32, i32, i32
  }
}

</mosaic_0001>

<bundles_post_ra>
// kernel: tpu_custom_call.1
= control target key start
LH: loop header
LB: loop body
LE: loop exit
PB: predicated region body
PF: predicated region fallthrough
CT: control target
= control target key end

     0   :  { %s1099_s0 = inlined_call_operand.vmem [shape: f32[2,8,256], index: 0, kind: input, shape index: {}]   ;;  %s1100_s1 = inlined_call_operand.vmem [shape: f32[2,8,256], index: 1, kind: input, shape index: {}]   ;;  %s1101_s2 = inlined_call_operand.vmem [shape: f32[16,8], index: 2, kind: input, shape index: {}]   ;;  %s1102_s3 = inlined_call_operand.vmem [shape: f32[16,8], index: 3, kind: input, shape index: {}]   ;;  %s1103_s4 = inlined_call_operand.vmem [shape: f32[16,1], index: 4, kind: input, shape index: {}]   ;;  %s1104_s5 = inlined_call_operand.vmem [shape: f32[1,16], index: 5, kind: input, shape index: {}]   ;;  %s1105_s6 = inlined_call_operand.<no memory space> [shape: f32[1], index: 6, kind: input, shape index: {}]   ;;  %s1106_s7 = inlined_call_operand.hbm [shape: f32[2,8,256], index: 7, kind: output, shape index: {}]  }
   0x1   :  { %12 = sst [smem:[#allocation2]] %s1105_s6 }
   0x2   :  { %13 = vsyncpa [#allocation4], 0 }
   0x3   :  { %15 = vsyncpa [#allocation4 + $0x1], 0  ;;  %s968_s26 = smov 0   ;;  %s970_s27 = smov 0  }
   0x4   :  { %s972_s28 = smov 0   ;;  %s974_s29 = smov 0  }
   0x5   :  { %s976_s30 = smov 0   ;;  %s978_s8 = smov 0  }
   0x6 LB: > { %s753_s6 = sadd.s32 4294967295, %s920_s8   ;;  %s754_s9 = sadd.s32 4294967294, %s920_s8   ;;  %s920_s8 = sphi %s978_s8, %s21_s8   ;;  %s916_s30 = sphi %s976_s30, %s1113_s30   ;;  %s912_s29 = sphi %s974_s29, %s1112_s29   ;;  %s908_s28 = sphi %s972_s28, %s1111_s28   ;;  %s904_s27 = sphi %s970_s27, %s1110_s27   ;;  %s900_s26 = sphi %s968_s26, %s1109_s26  }
   0x7   : > { %s33_s10 = sadd.s32 1, %s916_s30  ;;  %s203_s11 = sadd.s32 1, %s908_s28 }
   0x8   : > { %p35_p0 = scmp.ge.s32.totalorder %s33_s10, 2  ;;  %p213_p1 = scmp.ne.s32.totalorder %s908_s28, %s904_s27 }
   0x9   : > { %p214_p2 = scmp.eq.s32.totalorder %s753_s6, 1  ;;  %p219_p3 = scmp.ne.s32.totalorder %s904_s27, %s900_s26 }
   0xa   : > { %s1115_s10 = smov (%p35_p0, %s33_s10), 0  ;;  %p220_p5 = scmp.eq.s32.totalorder %s754_s9, 1 }
   0xb   : > { %p1008_p4 = por %p214_p2, %p213_p1  ;;  %s198_s13 = ssub.s32 %s916_s30, %s1115_s10 }
   0xc   : > { %p757_p6 = scmp.ge.s32.totalorder %s920_s8, 1  ;;  %p201_p7 = scmp.eq.s32.totalorder %s198_s13, 0 }
   0xd   : > { %p1015_p8 = por %p220_p5, %p219_p3  ;;  %p279_p9 = scmp.lt.s32.totalorder %s920_s8, 3 }
   0xe   : > { %s1021_s15 = scalar_select %p201_p7, %s908_s28, %s203_s11  }
   0xf   : > { %p280_p10 = pnand %p757_p6, %p279_p9 }
  0x10   : > { %p325_p11 = scmp.lt.s32.totalorder (!%p280_p10), %s912_s29, 1  ;;  %s352_s24 = sld [smem:[#allocation2]] (!%p280_p10) }
  0x11   : > { %283 = sbr.rel (%p280_p10) target bundleno = 485 (0x1e5), region = 48  ;;  %s777_s9 = sshll.u32 (!%p280_p10), %s912_s29, 8 }
  0x16   : > { %v922_v0 = vmov 0.0   ;;  %v351_v1 = vld [vmem:[%s1103_s4 + $0x8] sm:$0xff]  ;;  %s326_s18 = scalar_select %p325_p11, %s912_s29, 1  ;;  %v923_v2 = vmov 0   ;;  %v347_v3 = vld [vmem:[%s1102_s3] sm:$0xff]  ;;  %vm357_vm0 = vcmask 64512   ;;  %v542_v35 = vstv %s352_s24 }
  0x17   : > { %428 = vmatprep.mubr.f32.mxu0 %v922_v0  ;;  %511 = vmatprep.mubr.f32.mxu1 %v922_v0  ;;  %v345_v4 = vld [vmem:[%s1101_s2] sm:$0xff]  ;;  %v348_v10 = vld [vmem:[%s1102_s3 + $0x8] sm:$0xff]  ;;  %vm543_vm1 = vcmask 130048   ;;  %v630_v46 = vlaneseq  ;;  %s924_s29 = smov [#allocation3]  }
  0x18   : > { %835 = vset.pattern.permute.xlu0 %v923_v2  ;;  %s775_s19 = sshll.u32 %s326_s18, 4  ;;  %v350_v9 = vld [vmem:[%s1103_s4] sm:$0xff]  ;;  %v346_v11 = vld [vmem:[%s1101_s2 + $0x8] sm:$0xff]  ;;  %s657_s18 = scalar_lea.hbm %s1106_s7, %s777_s9 }
  0x19   : > { %531 = vperm.xlu0 %835, %v351_v1   ;;  %s342_s22 = scalar_lea.vmem %s1100_s1, %s775_s19  ;;  %s332_s25 = scalar_lea.vmem %s1099_s0, %s775_s19  ;;  %v349_v34 = vld [vmem:[%s1104_s5] sm:$0x1]  ;;  %v631_v47 = vshrl.u32 %v630_v46, 7 }
  0x1a   : > { %v1040_v5 = vld [vmem:[%s342_s22 + $0x8] sm:$0xff]  ;;  %v1042_v7 = vld [vmem:[%s342_s22] sm:$0xff]  ;;  %s848_s21 = sshll.u32 %s924_s29, 4  ;;  %s849_s21 = int_to_ptr.vmem [resolvable:$false] %s848_s21 }
  0x1b   : > { %v354_v6 = vld [vmem:[%s332_s25 + $0x8] sm:$0xff]  ;;  %394 = vmatprep.subr.mxu0 %v1040_v5  ;;  %v353_v8 = vld [vmem:[%s332_s25] sm:$0xff]  ;;  %s321_s25 = sand.u32 1, %s904_s27   ;;  %v632_v48 = vsub.s32 0, %v631_v47  ;;  %s850_s22 = scalar_lea.vmem %s849_s21, 512 }
  0x1c   : > { %477 = vmatprep.subr.mxu1 %v354_v6  ;;  %395 = vmatpush1.msra.mxu0 %v1042_v7  ;;  %s758_s6 = sshll.u32 %s321_s25, 4  ;;  %s643_s19 = scalar_lea.sflag [#allocation4], %s321_s25 }
  0x1d   : > { %478 = vmatpush1.msra.mxu1 %v353_v8  ;;  %763 = vmatmul.mubr.msk.f32.vlgmr.msra.gmra.mxu0 %vm357_vm0, %v347_v3  ;;  %s323_s11 = scalar_lea.vmem [#allocation3], %s758_s6 }
  0x1e   : > { %765 = vmatmul.mubr.msk.f32.vlgmr.msra.gmra.mxu1 %vm357_vm0, %v345_v4  ;;  %434 = vmatprep.mubr.f32.mxu0 %v922_v0  ;;  %s659_s13 = sshll.u32 %s323_s11, 4  ;;  %s660_s13 = int_to_ptr.vmem [resolvable:$true] %s659_s13 }
  0x1f   : > { %517 = vmatprep.mubr.f32.mxu1 %v922_v0  ;;  %526 = vperm.xlu0 %835, %v350_v9   ;;  %s844_s20 = scalar_lea.vmem %s660_s13, 256  ;;  %p851_p1 = scmp.lt.s32.totalorder %s660_s13, %s849_s21 }
  0x20   : > { %p845_p12 = scmp.ne.s32.totalorder %s660_s13, %s844_s20  ;;  %p852_p2 = scmp.lt.s32.totalorder %s850_s22, %s844_s20 }
  0x21   : > { %764 = vmatmul.mubr.msk.f32.gmra.mxu0 %vm357_vm0, %v348_v10 }
  0x22   : > { %766 = vmatmul.mubr.msk.f32.gmra.mxu1 %vm357_vm0, %v346_v11  ;;  %611 = vmatprep.mubr.f32.mxu0 %v922_v0  ;;  %p846_p13 = pnand %p845_p12, %p1008_p4  ;;  %p853_p3 = por %p852_p2, %p851_p1 }
  0x24   : > { %p847_p0 = pneg %p846_p13 }
  0x26   : > { %p854_p5 = pnand %p853_p3, %p847_p0 }
  0x94   : > { %v532_v14 = vpop.permute.xlu0 %531 }
  0x9a   : > { %v527_v24 = vpop.permute.xlu0 %526 }
  0xdd   : > { %v430_v12 = vpop.f32.mrf.mxu0 }
  0xde   : > { %v513_v13 = vpop.f32.mrf.mxu1 }
  0xdf   : > { %v432_v15 = vpop.f32.mrf.mxu0  ;;  %v514_v21 = vadd.f32 %v513_v13, %v430_v12 }
  0xe0   : > { %v515_v16 = vpop.f32.mrf.mxu1 }
  0xe1   : > { %v436_v17 = vpop.f32.mrf.mxu0  ;;  %v516_v19 = vadd.f32 %v515_v16, %v432_v15  ;;  %v534_v29 = vadd.f32 %v527_v24, %v514_v21 }
  0xe2   : > { %v519_v18 = vpop.f32.mrf.mxu1 }
  0xe3   : > { %v520_v20 = vadd.f32 %v519_v18, %v436_v17  ;;  %v438_v22 = vpop.f32.mrf.mxu0  ;;  %v535_v27 = vadd.f32 %v527_v24, %v516_v19  ;;  %v538_v33 = vmax.f32 %v534_v29, 0.0 }
  0xe4   : > { %v521_v23 = vpop.f32.mrf.mxu1 }
  0xe5   : > { %v522_v25 = vadd.f32 %v521_v23, %v438_v22  ;;  %v536_v26 = vadd.f32 %v532_v14, %v520_v20  ;;  %v539_v32 = vmax.f32 %v535_v27, 0.0 }
  0xe7   : > { %v537_v28 = vadd.f32 %v532_v14, %v522_v25  ;;  %v540_v31 = vmax.f32 %v536_v26, 0.0 }
  0xe9   : > { %v541_v30 = vmax.f32 %v537_v28, 0.0 }
  0xeb   : > { %575 = vmatprep.subr.mxu0 %v541_v30 }
  0xec   : > { %576 = vmatpush1.msra.mxu0 %v540_v31 }
  0xed   : > { %577 = vmatprep.subr.mxu0 %v539_v32 }
  0xee   : > { %578 = vmatpush1.msra.mxu0 %v538_v33 }
  0xef   : > { %767 = vmatmul.mubr.msk.f32.vlgmr.msra.gmra.mxu0 %vm543_vm1, %v349_v34 }
 0x1af   : > { %v613_v36 = vpop.f32.mrf.mxu0 }
 0x1b0   : > { %v614_v37 = vadd.f32 %v613_v36, %v542_v35 }
 0x1b1   : > { %v615_v38 = vpop.f32.mrf.mxu0 }
 0x1b2   : > { %v768_v39 = vmul.f32 -1.442695, %v614_v37  ;;  %v616_v40 = vadd.f32 %v615_v38, %v542_v35 }
 0x1b4   : > { %836 = vpow2.f32 %v768_v39  ;;  %v769_v41 = vmul.f32 -1.442695, %v616_v40 }
 0x1b6   : > { %838 = vpow2.f32 %v769_v41 }
 0x1c1   : > { %v837_v42 = vpop.eup %836 }
 0x1c2   : > { %v624_v43 = vadd.f32 1.0, %v837_v42 }
 0x1c3   : > { %v839_v44 = vpop.eup %838 }
 0x1c4   : > { %840 = vrcp.f32 %v624_v43  ;;  %v625_v45 = vadd.f32 1.0, %v839_v44 }
 0x1c6   : > { %842 = vrcp.f32 %v625_v45 }
 0x1d1   : > { %v841_v49 = vpop.eup %840 }
 0x1d2   : > { %v633_v50 = vrot.slane %v841_v49, %v632_v48 }
 0x1d3   : > { %v843_v51 = vpop.eup %842 }
 0x1d4   : > { %v637_v52 = vrot.slane %v843_v51, %v632_v48  ;;  %v638_v53 = vmul.f32 %v633_v50, %v1042_v7 }
 0x1d6   : > { %v639_v54 = vmul.f32 %v637_v52, %v1040_v5  ;;  %640 = vst [vmem:[%s323_s11] sm:$0xff] %v638_v53 }
 0x1d8   : > { %641 = vst [vmem:[%s323_s11 + $0x8] sm:$0xff] %v639_v54 }
 0x1d9   : > { %857 = shalt.err (!%p854_p5)
}
 0x1da   : > { %s858_s23 = scalar_lea.hbm %s657_s18, 256  ;;  %s862_s6 = scalar_lea.hbm %s1106_s7, 512 }
 0x1db   : > { %p859_p6 = scmp.ne.s32.totalorder %s657_s18, %s858_s23  ;;  %p863_p10 = scmp.lt.s32.totalorder %s657_s18, %s1106_s7 }
 0x1dc   : > { %p864_p11 = scmp.lt.s32.totalorder %s862_s6, %s858_s23 }
 0x1dd   : > { %p860_p7 = pnand %p859_p6, %p1008_p4 }
 0x1de   : > { %p865_p12 = por %p864_p11, %p863_p10 }
 0x1df   : > { %p861_p9 = pneg %p860_p7 }
 0x1e1   : > { %p866_p13 = pnand %p865_p12, %p861_p9 }
 0x1e3   : > { %869 = shalt.err (!%p866_p13)
}
 0x1e4   : > { %778 = dma.vmem_to_hbm [thread:$0]  (%p1008_p4), %s660_s13, 256, %s657_s18, %s643_s19  }
 0x1e5 PF: > { %p784_p0 = scmp.ge.s32.totalorder %s920_s8, 2  ;;  %s671_s16 = sand.u32 1, %s900_s26  }
 0x1e6   : > { %s672_s17 = scalar_lea.sflag [#allocation4], %s671_s16 }
 0x1e7   : > { %p781_p1 = pnand %p784_p0, %p1015_p8 }
 0x1e9   : > { %p782_p2 = pneg %p781_p1 }
 0x1eb   : > { %895 = dma.done.wait (%p782_p2), %s672_s17, 256  }
 0x1ec   : > { %897 = vsyncadd (%p782_p2), %s672_s17, 4294967040  ;;  %s21_s8 = sadd.s32 1, %s920_s8   ;;  %s1109_s26 = smov %s904_s27 }
 0x1ed   : > { %p18_p3 = scmp.ge.s32.totalorder %s21_s8, 4   ;;  %s1110_s27 = smov %s908_s28 }
 0x1ee   : > { %s1111_s28 = smov %s1021_s15  ;;  %s1112_s29 = smov %s916_s30 }
 0x1ef   : > { %s1113_s30 = smov %s1115_s10  ;;  %20 = sbr.rel (!%p18_p3) target bundleno = 6 (0x6), region = 86 }
 0x1f4   :  { %677 = vsyncpa [#allocation4], 1 }
 0x1f5   :  { %679 = vsyncpa [#allocation4 + $0x1], 1 }

</bundles_post_ra>
